<compile_context>
chip_gen: v5e
topology: v5e:2x2
jax: 0.10.0
libtpu: 0.0.40
codegen_flags: <defaults>
</compile_context>

<pallas_src>
import functools

import jax
import jax.numpy as jnp
from jax.experimental import pallas as pl
from jax.experimental.pallas import tpu as pltpu


def _softmax_body_kernel(x_ref, u_ref, probs_ref, action_ref, *, temperature):
    # Temperature-scaled logits, matching PyTorch: softmax(outputs * T, dim=1).
    s = x_ref[...].astype(jnp.float32) * temperature            # (1, A)

    # ---- softmax along the lane axis ----
    m = jnp.max(s, axis=1, keepdims=True)                       # (1, 1)
    e = jnp.exp(s - m)                                          # EUP
    z = jnp.sum(e, axis=1, keepdims=True)                       # XLU reduce
    probs_ref[...] = (e / z).astype(probs_ref.dtype)            # exact (1e-5 tol)

    # ---- multinomial(num_samples=1) via Gumbel-max ----
    # argmax(s + g), g = -log(-log(u)): one XLU max-reduce + EUP-only noise,
    # no cumsum chain and no tail fp-accumulation bias.
    u = jnp.maximum(u_ref[...], 1e-12)                          # guard log(0)
    g = -jnp.log(-jnp.log(u))                                   # (1, A), EUP
    y = s + g
    best = jnp.max(y, axis=1, keepdims=True)                    # (1, 1)
    num_actions = y.shape[1]
    idx = jax.lax.broadcasted_iota(jnp.int32, y.shape, 1)       # (1, A)
    cand = jnp.where(y >= best, idx, num_actions)               # first max wins
    amin = jnp.min(cand, axis=1, keepdims=True).astype(jnp.int32)
    action_ref[0, 0] = amin[0, 0]                               # scalar SMEM store


@functools.partial(jax.jit, static_argnums=(2,))
def _softmax_body_sample(outputs, key, temperature):
    outputs = outputs.astype(jnp.float32)
    b, a = outputs.shape
    # `int(action.item())` in the PyTorch module implies batch == 1.
    assert b == 1

    # Uniforms drawn host-side with jax.random (portable to interpret mode;
    # pltpu.prng_* is TPU-only).  Same key => reproducible sample.
    u = jax.random.uniform(key, (b, a), dtype=jnp.float32)

    kernel = functools.partial(_softmax_body_kernel,
                               temperature=float(temperature))

    probs, action = pl.pallas_call(
        kernel,
        out_shape=(
            jax.ShapeDtypeStruct((b, a), jnp.float32),
            jax.ShapeDtypeStruct((1, 1), jnp.int32),
        ),
        in_specs=[
            pl.BlockSpec(memory_space=pltpu.MemorySpace.VMEM),   # logits
            pl.BlockSpec(memory_space=pltpu.MemorySpace.VMEM),   # uniforms
        ],
        out_specs=(
            pl.BlockSpec(memory_space=pltpu.MemorySpace.VMEM),   # probs
            pl.BlockSpec(memory_space=pltpu.MemorySpace.SMEM),   # action scalar
        ),
    )(outputs, u)
    return action, probs


def softmax_body_forward(outputs, temperature, key):
    """Mirrors SoftmaxBody.forward.

    Returns (action, probs) as device arrays: action is (1, 1) int32, probs is
    (1, A) float32.  No host sync here -- call int(action[0, 0]) yourself only
    when a Python int is truly needed (matches the perf guidance).
    """
    return _softmax_body_sample(jnp.asarray(outputs, jnp.float32), key,
                                float(temperature))


if __name__ == "__main__":
    key = jax.random.PRNGKey(0)
    k_logits, k_sample = jax.random.split(key)

    # SoftmaxBody has no weights; its only parameter is the temperature T.
    T = 7.0
    num_actions = 8
    outputs = jax.random.normal(k_logits, (1, num_actions), dtype=jnp.float32)

    action_dev, probs = softmax_body_forward(outputs, T, k_sample)
    probs = jax.block_until_ready(probs)
    # Single host sync, outside the hot path, just like the caller would do.
    action = int(jax.device_get(action_dev)[0, 0])

    # softmax check against pure-JAX reference
    ref_probs = jax.nn.softmax(outputs * T, axis=1)
    assert jnp.allclose(probs, ref_probs, atol=1e-5), "softmax mismatch"
    assert abs(float(jnp.sum(probs)) - 1.0) < 1e-5

    # sampling check: same key => same uniforms => same Gumbel-max winner
    u = jax.random.uniform(k_sample, (1, num_actions), dtype=jnp.float32)
    g = -jnp.log(-jnp.log(jnp.maximum(u, 1e-12)))
    ref_action = int(jnp.argmax(outputs * T + g, axis=1)[0])
    assert isinstance(action, int) and 0 <= action < num_actions
    assert action == ref_action, (action, ref_action)

    print("KERNEL_OK")
</pallas_src>

<mosaic_0001>
module attributes {stable_mosaic.version = 11 : i64} {
  func.func @_softmax_body_kernel(%arg0: memref<1x8xf32, #tpu.memory_space<vmem>>, %arg1: memref<1x8xf32, #tpu.memory_space<vmem>>, %arg2: memref<1x8xf32, #tpu.memory_space<vmem>>, %arg3: memref<1x1xi32, #tpu.memory_space<smem>>) attributes {dimension_semantics = [], scalar_prefetch = 0 : i64, scratch_operands = 0 : i64, tpu.core_type = #tpu.core_type<tc>} {
    %c0 = arith.constant 0 : index
    %c0_0 = arith.constant 0 : index
    %0 = vector.load %arg0[%c0, %c0_0] : memref<1x8xf32, #tpu.memory_space<vmem>>, vector<1x8xf32>
    %cst = arith.constant 7.000000e+00 : f32
    %1 = vector.broadcast %cst : f32 to vector<1x8xf32>
    %2 = arith.mulf %0, %1 : vector<1x8xf32>
    %cst_1 = arith.constant dense<0xFF800000> : vector<1xf32>
    %3 = vector.multi_reduction <maximumf>, %2, %cst_1 [1] : vector<1x8xf32> to vector<1xf32>
    %4 = vector.shape_cast %3 : vector<1xf32> to vector<1x1xf32>
    %5 = vector.broadcast %4 : vector<1x1xf32> to vector<1x8xf32>
    %6 = arith.subf %2, %5 : vector<1x8xf32>
    %7 = math.exp %6 : vector<1x8xf32>
    %cst_2 = arith.constant dense<0.000000e+00> : vector<1xf32>
    %8 = vector.multi_reduction <add>, %7, %cst_2 [1] : vector<1x8xf32> to vector<1xf32>
    %9 = vector.shape_cast %8 : vector<1xf32> to vector<1x1xf32>
    %10 = vector.broadcast %9 : vector<1x1xf32> to vector<1x8xf32>
    %11 = arith.divf %7, %10 : vector<1x8xf32>
    %c0_3 = arith.constant 0 : index
    %c0_4 = arith.constant 0 : index
    %12 = vector.load %arg2[%c0_3, %c0_4] : memref<1x8xf32, #tpu.memory_space<vmem>>, vector<1x8xf32>
    tpu.vector_store %arg2[%c0_3, %c0_4], %11 {strides = array<i32>} : memref<1x8xf32, #tpu.memory_space<vmem>>, vector<1x8xf32>,
    %c0_5 = arith.constant 0 : index
    %c0_6 = arith.constant 0 : index
    %13 = vector.load %arg1[%c0_5, %c0_6] : memref<1x8xf32, #tpu.memory_space<vmem>>, vector<1x8xf32>
    %cst_7 = arith.constant 9.99999996E-13 : f32
    %14 = vector.broadcast %cst_7 : f32 to vector<1x8xf32>
    %15 = arith.maximumf %13, %14 : vector<1x8xf32>
    %16 = math.log %15 : vector<1x8xf32>
    %cst_8 = arith.constant 0.000000e+00 : f32
    %17 = vector.broadcast %cst_8 : f32 to vector<1x8xf32>
    %18 = arith.subf %17, %16 : vector<1x8xf32>
    %19 = math.log %18 : vector<1x8xf32>
    %cst_9 = arith.constant 0.000000e+00 : f32
    %20 = vector.broadcast %cst_9 : f32 to vector<1x8xf32>
    %21 = arith.subf %20, %19 : vector<1x8xf32>
    %22 = arith.addf %2, %21 : vector<1x8xf32>
    %cst_10 = arith.constant dense<0xFF800000> : vector<1xf32>
    %23 = vector.multi_reduction <maximumf>, %22, %cst_10 [1] : vector<1x8xf32> to vector<1xf32>
    %24 = vector.shape_cast %23 : vector<1xf32> to vector<1x1xf32>
    %25 = tpu.iota {dimensions = array<i32: 1>} : vector<1x8xi32>
    %26 = vector.broadcast %24 : vector<1x1xf32> to vector<1x8xf32>
    %27 = arith.cmpf oge, %22, %26 : vector<1x8xf32>
    %c8_i32 = arith.constant 8 : i32
    %28 = vector.broadcast %c8_i32 : i32 to vector<1x8xi32>
    %29 = arith.select %27, %25, %28 : vector<1x8xi1>, vector<1x8xi32>
    %cst_11 = arith.constant dense<2147483647> : vector<1xi32>
    %30 = vector.multi_reduction <minsi>, %29, %cst_11 [1] : vector<1x8xi32> to vector<1xi32>
    %31 = vector.shape_cast %30 : vector<1xi32> to vector<1x1xi32>
    %32 = vector.extract %31[0, 0] : i32 from vector<1x1xi32>
    %c0_12 = arith.constant 0 : index
    %c0_13 = arith.constant 0 : index
    %33 = memref.load %arg3[%c0_12, %c0_13] : memref<1x1xi32, #tpu.memory_space<smem>>
    memref.store %32, %arg3[%c0_12, %c0_13] : memref<1x1xi32, #tpu.memory_space<smem>>
    return
  }
}

</mosaic_0001>

<bundles_post_ra>
// kernel: _softmax_body_sample.1
= control target key start
LH: loop header
LB: loop body
LE: loop exit
PB: predicated region body
PF: predicated region fallthrough
CT: control target
= control target key end

     0   :  { %9 = vsyncpa [#allocation3], 0  ;;  %s199_s0 = inlined_call_operand.vmem [shape: f32[1,8], index: 0, kind: input, shape index: {}]   ;;  %s200_s1 = inlined_call_operand.vmem [shape: f32[1,8], index: 1, kind: input, shape index: {}]   ;;  %s201_s2 = inlined_call_operand.hbm [shape: f32[1,8], index: 2, kind: output, shape index: {0}]   ;;  %s202_s3 = inlined_call_operand.hbm [shape: s32[1,1], index: 3, kind: output, shape index: {1}]  }
   0x1   :  { %v15_v0 = vld [vmem:[%s199_s0] sm:$0x1] }
   0x2   :  { %v43_v1 = vld [vmem:[%s200_s1] sm:$0x1]  ;;  %v16_v2 = vmul.f32 7.0, %v15_v0 }
   0x3   :  { %v44_v3 = vmax.f32 %v43_v1, 1e-12 }
   0x4   :  { %10 = vsyncpa [#allocation4], 0  ;;  %vm17_vm0 = vcmask 57344   ;;  %v55_v18 = vlaneseq  ;;  %s160_s0 = smov [#allocation2]   ;;  %s84_s18 = sshll.u32 %s201_s2, 4  ;;  %s85_s18 = int_to_ptr.hbm [resolvable:$true] %s84_s18 }
   0x5   :  { %112 = vlog2.f32 %v44_v3  ;;  %v18_v4 = vsel %vm17_vm0, %v16_v2, -inf  ;;  %s82_s1 = sshll.u32 %s160_s0, 4  ;;  %s93_s21 = sshll.u32 %s202_s3, 4  ;;  %s83_s1 = int_to_ptr.vmem [resolvable:$true] %s82_s1  ;;  %s94_s21 = int_to_ptr.hbm [resolvable:$true] %s93_s21 }
   0x6   :  { %19 = vmax.xlane.f32.xlu1 %v18_v4  ;;  %v56_v19 = vand.u32 127, %v55_v18  ;;  %s161_s23 = smov [#allocation5]  }
   0xb   :  { %v113_v5 = vpop.eup %112 }
   0xc   :  { %v46_v6 = vmul.f32 0.6931472, %v113_v5 }
   0xe   :  { %v47_v7 = vsub.f32 0.0, %v46_v6 }
  0x10   :  { %114 = vlog2.f32 %v47_v7 }
  0x16   :  { %v115_v8 = vpop.eup %114 }
  0x17   :  { %v49_v9 = vmul.f32 0.6931472, %v115_v8 }
  0x19   :  { %v50_v10 = vsub.f32 0.0, %v49_v9 }
  0x1b   :  { %v51_v11 = vadd.f32 %v50_v10, %v16_v2 }
  0x1d   :  { %v52_v12 = vsel %vm17_vm0, %v51_v11, -inf }
  0x1e   :  { %53 = vmax.xlane.f32.xlu0 %v52_v12 }
  0x79   :  { %v20_v13 = vpop.xlane.xlu1 %19 }
  0x7a   :  { %v21_v14 = vsub.f32 %v16_v2, %v20_v13 }
  0x7c   :  { %v22_v15 = vmul.f32 1.442695, %v21_v14 }
  0x7e   :  { %116 = vpow2.f32 %v22_v15 }
  0x84   :  { %v117_v16 = vpop.eup %116 }
  0x85   :  { %v24_v17 = vsel %vm17_vm0, %v117_v16, 0.0 }
  0x86   :  { %25 = vadd.xlane.f32.xlu2 %v24_v17 }
  0x91   :  { %v54_v20 = vpop.xlane.xlu0 %53 }
  0x92   :  { %vm57_vm1 = vcmp.ge.f32.partialorder %v51_v11, %v54_v20 }
  0x93   :  { %v58_v21 = vsel %vm57_vm1, %v56_v19, 8 }
  0x94   :  { %v59_v22 = vsel %vm17_vm0, %v58_v21, 2147483647 }
  0x95   :  { %v61_v23 = vshra.s32 %v59_v22, 16  ;;  %v60_v30 = vand.u32 65535, %v59_v22 }
  0x97   :  { %v63_v24 = vcvt.s32.f32 %v61_v23  ;;  %v62_v35 = vcvt.s32.f32 %v60_v30 }
  0x99   :  { %64 = vmin.xlane.f32.xlu0 %v63_v24 }
  0xf9   :  { %v26_v25 = vpop.xlane.xlu2 %25 }
  0xfa   :  { %118 = vrcp.f32 %v26_v25  ;;  %v38_v31 = vand.u32 2147483648, %v26_v25  ;;  %vm32_vm2 = vweird.f32 %v26_v25  ;;  %v36_v32 = vand.u32 2147483647, %v26_v25 }
  0xfc   :  { %v39_v36 = vor.u32 1.1754944e-38, %v38_v31  ;;  %vm37_vm6 = vcmp.eq.f32.partialorder %v36_v32, 8.507059e+37 }
 0x100   :  { %v119_v26 = vpop.eup %118 }
 0x101   :  { %v28_v27 = vmul.f32 %v119_v26, %v26_v25  ;;  %vm33_vm3 = vweird.f32 %v119_v26 }
 0x102   :  { %vm34_vm4 = vmor %vm32_vm2, %vm33_vm3 }
 0x103   :  { %v29_v28 = vsub.f32 1.0, %v28_v27 }
 0x105   :  { %v30_v29 = vmul.f32 %v119_v26, %v29_v28 }
 0x107   :  { %v31_v33 = vadd.f32 %v119_v26, %v30_v29 }
 0x109   :  { %v35_v38 = vsel %vm34_vm4, %v119_v26, %v31_v33 }
 0x10a   :  { %v40_v39 = vsel %vm37_vm6, %v39_v36, %v35_v38 }
 0x10b   :  { %v41_v40 = vmul.f32 %v117_v16, %v40_v39 }
 0x10c   :  { %v65_v34 = vpop.xlane.xlu0 %64 }
 0x10d   :  { %vm66_vm5 = vcmp.eq.f32.partialorder %v63_v24, %v65_v34  ;;  %42 = vst.msk [vmem:[#allocation2] sm:$0x1] %vm17_vm0, %v41_v40  ;;  %v71_v41 = vcvt.f32.s32 %v65_v34 }
 0x10e   :  { %v67_v37 = vsel %vm66_vm5, %v62_v35, inf  ;;  %87 = dma.vmem_to_hbm [thread:$0]  %s83_s1, 16, %s85_s18, [#allocation3]  }
 0x10f   :  { %68 = vmin.xlane.f32.xlu1 %v67_v37  ;;  %v72_v43 = vshll.u32 %v71_v41, 16 }
 0x182   :  { %v69_v42 = vpop.xlane.xlu1 %68 }
 0x183   :  { %v70_v44 = vcvt.f32.s32 %v69_v42 }
 0x185   :  { %v73_v45 = vadd.s32 %v72_v43, %v70_v44 }
 0x187   :  { %108 = vpush %v73_v45 }
 0x1b8   :  { %s109_s22 = spop %108 }
 0x1b9   :  { %76 = sst [smem:[#allocation5]] %s109_s22 }
 0x1ba   :  { %96 = dma.smem_to_hbm %s161_s23, 16, %s94_s21, [#allocation4]  }
 0x1bb   :  { %156 = dma.done.wait [#allocation3], 16  }
 0x1bc   :  { %157 = vsyncadd [#allocation3], 4294967280 }
 0x1bd   :  { %158 = dma.done.wait [#allocation4], 16  }
 0x1be   :  { %159 = vsyncadd [#allocation4], 4294967280 }
 0x1bf   :  { %105 = sfence }
 0x1c0   :  { %106 = vsyncpa [#allocation3], 1 }
 0x1c1   :  { %107 = vsyncpa [#allocation4], 1 }

</bundles_post_ra>
